<compile_context>
chip_gen: v7x
topology: tpu7x:2x2x1
jax: 0.10.0
libtpu: 0.0.40
codegen_flags: <defaults>
</compile_context>

<pallas_src>
import numpy as np
import jax
import jax.numpy as jnp
from jax import lax
from jax.experimental import pallas as pl
from jax.experimental.pallas import tpu as pltpu


# ----------------------------- Pallas kernel ------------------------------- #

def _spearman_loss_kernel(s_ref, idx_ref, o_ref):
    # layout: s_ref   (1, 2N) f32  descending-sorted theta, [input | target]
    #         idx_ref (1, 2N) i32  [0..N-1 | sigma_inv] composed un-sort indices
    #         o_ref   (1, 1)  f32  the Spearman loss. Single tile.
    n2 = s_ref.shape[1]
    n = n2 // 2
    s = s_ref[...]
    idx2 = idx_ref[...]

    neg_inf = jnp.float32(-jnp.inf)
    pos_inf = jnp.float32(jnp.inf)
    inv_n = jnp.float32(1.0 / n)

    lane2 = lax.broadcasted_iota(jnp.int32, (1, n2), 1)      # packed lane index
    khalf = jnp.where(lane2 >= n, lane2 - n, lane2)          # within-half index k
    left_row = lane2 < n

    row = lax.broadcasted_iota(jnp.int32, (n, n2), 0)        # j (sorted slot)
    col2 = lax.broadcasted_iota(jnp.int32, (n, n2), 1)       # packed lane index
    kcol = jnp.where(col2 >= n, col2 - n, col2)              # within-half index k
    upper = row <= kcol
    lhalf = col2 < n
    inv_len = 1.0 / jnp.maximum(kcol - row + 1, 1).astype(jnp.float32)

    # y = s - w with w = [n, n-1, ..., 1] replicated in each lane half.
    w_row = (n - khalf).astype(jnp.float32)
    y = s - w_row

    # Inclusive prefix sum within each half (Hillis-Steele ladder, single pass
    # for both problems; (lane % N)-mask kills contributions that wrap across
    # the half boundary).
    c = y
    d = 1
    while d < n:
        shifted = pltpu.roll(c, shift=d, axis=1)
        c = c + jnp.where(khalf >= d, shifted, 0.0)
        d *= 2

    # Exclusive prefix sum e = c - y; one (N,1) column per problem
    # (masked lane-reduce instead of a fragile sub-tile transpose).
    e = c - y
    ex_col = jnp.sum(jnp.where(col2 == row, e, 0.0), axis=1, keepdims=True)      # (N,1)
    et_col = jnp.sum(jnp.where(col2 == row + n, e, 0.0), axis=1, keepdims=True)  # (N,1)

    # Segment means M[j, k] = mean(y[j..k]) = (c[k] - e[j]) / (k - j + 1),
    # masked to the upper triangle, -inf elsewhere. Both problems packed.
    seg = c - jnp.where(lhalf, ex_col, et_col)               # (N, 2N)
    m = jnp.where(upper, seg * inv_len, neg_inf)

    # A[j, i] = max_{k >= i} M[j, k]: reverse running max within each half
    # (log2(N) roll + masked max steps, issued once for both problems).
    a = m
    d = 1
    while d < n:
        shifted = pltpu.roll(a, shift=n2 - d, axis=1)        # value at l = a[(l + d) mod 2N]
        a = jnp.maximum(a, jnp.where(kcol < n - d, shifted, neg_inf))
        d *= 2

    # Isotonic fit v_i = min_{j <= i} A[j, i]; rank_sorted = s - v (both halves).
    v = jnp.min(jnp.where(upper, a, pos_inf), axis=0, keepdims=True)   # (1, 2N)
    r = s - v

    # Per-half mean-centering and squared norms (permutation invariant).
    sum_all = jnp.sum(r, keepdims=True)
    sum0 = jnp.sum(jnp.where(left_row, r, 0.0), keepdims=True)
    sum1 = sum_all - sum0
    rc = r - jnp.where(left_row, sum0, sum1) * inv_n

    rc2 = rc * rc
    ss_all = jnp.sum(rc2, keepdims=True)
    ss0 = jnp.sum(jnp.where(left_row, rc2, 0.0), keepdims=True)
    ss1 = ss_all - ss0

    # Un-sort cross term via the composed permutation: idx2 = [identity | sigma_inv]
    # so row j of the one-hot picks lanes j (left half) and sigma[j]+N (right half):
    #   both_col[j] = rcx_c[j] + rct_c[sigma[j]]
    # and since sigma is a bijection, sum(both^2) = ss0 + ss1 + 2*cross.
    cm = row == idx2                                         # (N, 2N) one-hot pair mask
    both_col = jnp.sum(jnp.where(cm, rc, 0.0), axis=1, keepdims=True)   # (N, 1)
    both_sq = jnp.sum(both_col * both_col, keepdims=True)
    cross = 0.5 * (both_sq - ss0 - ss1)

    # loss = -(rx/||rx||) . (rt/||rt||); single rsqrt runs on the EUP.
    # NOTE: like the torch reference, no epsilon guard — a constant input
    # vector (zero norm) gives NaN, matching the original module's behavior.
    o_ref[...] = -(cross * lax.rsqrt(ss0 * ss1))


# ------------------------------ JAX wrapper --------------------------------- #

def spearman_rank_loss(input_arr, target_arr,
                       regularization="l2", regularization_strength=1.0):
    """Mirrors SpearmanRankLoss.forward."""
    if regularization != "l2":
        raise NotImplementedError("only 'l2' soft-rank regularization is implemented")

    x = input_arr.reshape(-1).astype(jnp.float32)
    t = target_arr.reshape(-1).astype(jnp.float32)
    n = x.shape[0]
    theta = jnp.stack([x, t], axis=0) / regularization_strength   # (2, N)

    # TODO(synk): the descending argsort + gather into the sorted domain stay in
    # plain JAX — data-dependent sorting has no clean Pallas TPU equivalent.
    perm = jnp.argsort(-theta, axis=1)                             # (2, N) descending
    s = jnp.take_along_axis(theta, perm, axis=1)                   # sorted descending
    s_packed = s.reshape(1, 2 * n)                                 # lanes: [x_sorted | t_sorted]

    # Composed un-sort permutation: sigma_inv[k] = x-sorted slot of the element
    # sitting at t-sorted slot k  (= argsort(perm_x)[perm_t]).
    px_inv = jnp.argsort(perm[0])
    sigma_inv = px_inv[perm[1]]
    idx2 = jnp.concatenate([jnp.arange(n, dtype=jnp.int32),
                            sigma_inv.astype(jnp.int32)])[None, :]  # (1, 2N)

    # VMEM request sized from the real live set (~a dozen (N, 2N) f32 tiles),
    # capped at 32 MiB to stay well within v7x's 64 MiB physical VMEM.
    live_bytes = 12 * (2 * n * n) * 4
    vmem_limit = int(min(32 * 1024 * 1024, max(2 * 1024 * 1024, 2 * live_bytes)))

    out = pl.pallas_call(
        _spearman_loss_kernel,
        out_shape=jax.ShapeDtypeStruct((1, 1), jnp.float32),
        grid=(1,),
        in_specs=[pl.BlockSpec((1, 2 * n), lambda i: (0, 0)),
                  pl.BlockSpec((1, 2 * n), lambda i: (0, 0))],
        out_specs=pl.BlockSpec((1, 1), lambda i: (0, 0)),
        compiler_params=pltpu.CompilerParams(
            dimension_semantics=("arbitrary",),
            vmem_limit_bytes=vmem_limit),
    )(s_packed, idx2)
    return out[0, 0]


# --------------------------- numpy reference (check) ------------------------ #

def _pav_decreasing_np(y):
    means, counts = [], []
    for val in y:
        m, c = float(val), 1
        while means and means[-1] < m:
            pm, pc = means.pop(), counts.pop()
            m = (pm * pc + m * c) / (pc + c)
            c = pc + c
        means.append(m)
        counts.append(c)
    return np.concatenate([np.full(c, m) for m, c in zip(means, counts)])


def _soft_rank_np(x, strength=1.0):
    x = np.asarray(x, dtype=np.float64).reshape(-1)
    n = x.size
    theta = x / strength
    perm = np.argsort(-theta)
    s = theta[perm]
    w = np.arange(n, 0, -1, dtype=np.float64)
    v = _pav_decreasing_np(s - w)
    rank_sorted = s - v
    return rank_sorted[np.argsort(perm)]


def _loss_ref_np(inp, tgt, strength=1.0):
    ri = _soft_rank_np(inp, strength)
    rt = _soft_rank_np(tgt, strength)
    ri = ri - ri.mean()
    ri = ri / np.linalg.norm(ri)
    rt = rt - rt.mean()
    rt = rt / np.linalg.norm(rt)
    return float(-(ri * rt).sum())


# ----------------------------------- main ----------------------------------- #

if __name__ == "__main__":
    key = jax.random.PRNGKey(0)
    k1, k2 = jax.random.split(key)
    # Small shapes; forward flattens to a single vector of length 64 anyway.
    inp = 3.0 * jax.random.normal(k1, (4, 16), dtype=jnp.float32)
    tgt = 3.0 * jax.random.normal(k2, (4, 16), dtype=jnp.float32)

    loss_fn = jax.jit(lambda a, b: spearman_rank_loss(a, b))
    loss = jax.block_until_ready(loss_fn(inp, tgt))

    ref = _loss_ref_np(np.asarray(inp), np.asarray(tgt))
    assert np.isfinite(float(loss)), float(loss)
    assert abs(float(loss) - ref) < 1e-3, (float(loss), ref)
    print("KERNEL_OK")
</pallas_src>

<mosaic_0001>
module attributes {stable_mosaic.version = 11 : i64} {
  func.func @_spearman_loss_kernel(%arg0: i32, %arg1: memref<1x128xf32, #tpu.memory_space<vmem>>, %arg2: memref<1x128xi32, #tpu.memory_space<vmem>>, %arg3: memref<1x1xf32, #tpu.memory_space<vmem>>) attributes {dimension_semantics = [#tpu.dimension_semantics<arbitrary>], iteration_bounds = array<i64: 1>, scalar_prefetch = 0 : i64, scratch_operands = 0 : i64, tpu.core_type = #tpu.core_type<tc>, window_params = [{pipeline_mode = #tpu.pipeline_mode<synchronous>, transform_indices = @transform_0, window_bounds = array<i64: 1, 128>}, {pipeline_mode = #tpu.pipeline_mode<synchronous>, transform_indices = @transform_1, window_bounds = array<i64: 1, 128>}, {pipeline_mode = #tpu.pipeline_mode<synchronous>, transform_indices = @transform_2, window_bounds = array<i64: 1, 1>}]} {
    %c0 = arith.constant 0 : index
    %c0_0 = arith.constant 0 : index
    %0 = vector.load %arg1[%c0, %c0_0] : memref<1x128xf32, #tpu.memory_space<vmem>>, vector<1x128xf32>
    %c0_1 = arith.constant 0 : index
    %c0_2 = arith.constant 0 : index
    %1 = vector.load %arg2[%c0_1, %c0_2] : memref<1x128xi32, #tpu.memory_space<vmem>>, vector<1x128xi32>
    %2 = tpu.iota {dimensions = array<i32: 1>} : vector<1x128xi32>
    %c64_i32 = arith.constant 64 : i32
    %3 = vector.broadcast %c64_i32 : i32 to vector<1x128xi32>
    %4 = arith.cmpi sge, %2, %3 : vector<1x128xi32>
    %c64_i32_3 = arith.constant 64 : i32
    %5 = vector.broadcast %c64_i32_3 : i32 to vector<1x128xi32>
    %6 = arith.subi %2, %5 : vector<1x128xi32>
    %7 = arith.select %4, %6, %2 : vector<1x128xi1>, vector<1x128xi32>
    %c64_i32_4 = arith.constant 64 : i32
    %8 = vector.broadcast %c64_i32_4 : i32 to vector<1x128xi32>
    %9 = arith.cmpi slt, %2, %8 : vector<1x128xi32>
    %10 = tpu.iota {dimensions = array<i32: 0>} : vector<64x128xi32>
    %11 = tpu.iota {dimensions = array<i32: 1>} : vector<64x128xi32>
    %c64_i32_5 = arith.constant 64 : i32
    %12 = vector.broadcast %c64_i32_5 : i32 to vector<64x128xi32>
    %13 = arith.cmpi sge, %11, %12 : vector<64x128xi32>
    %c64_i32_6 = arith.constant 64 : i32
    %14 = vector.broadcast %c64_i32_6 : i32 to vector<64x128xi32>
    %15 = arith.subi %11, %14 : vector<64x128xi32>
    %16 = arith.select %13, %15, %11 : vector<64x128xi1>, vector<64x128xi32>
    %17 = arith.cmpi sle, %10, %16 : vector<64x128xi32>
    %c64_i32_7 = arith.constant 64 : i32
    %18 = vector.broadcast %c64_i32_7 : i32 to vector<64x128xi32>
    %19 = arith.cmpi slt, %11, %18 : vector<64x128xi32>
    %20 = arith.subi %16, %10 : vector<64x128xi32>
    %c1_i32 = arith.constant 1 : i32
    %21 = vector.broadcast %c1_i32 : i32 to vector<64x128xi32>
    %22 = arith.addi %20, %21 : vector<64x128xi32>
    %c1_i32_8 = arith.constant 1 : i32
    %23 = vector.broadcast %c1_i32_8 : i32 to vector<64x128xi32>
    %24 = arith.maxsi %22, %23 : vector<64x128xi32>
    %25 = arith.sitofp %24 : vector<64x128xi32> to vector<64x128xf32>
    %cst = arith.constant 1.000000e+00 : f32
    %26 = vector.broadcast %cst : f32 to vector<64x128xf32>
    %27 = arith.divf %26, %25 : vector<64x128xf32>
    %c64_i32_9 = arith.constant 64 : i32
    %28 = vector.broadcast %c64_i32_9 : i32 to vector<1x128xi32>
    %29 = arith.subi %28, %7 : vector<1x128xi32>
    %30 = arith.sitofp %29 : vector<1x128xi32> to vector<1x128xf32>
    %31 = arith.subf %0, %30 : vector<1x128xf32>
    %c1_i32_10 = arith.constant 1 : i32
    %32 = tpu.dynamic_rotate %31 by %c1_i32_10 dim 1 : vector<1x128xf32>, i32 -> vector<1x128xf32>
    %c1_i32_11 = arith.constant 1 : i32
    %33 = vector.broadcast %c1_i32_11 : i32 to vector<1x128xi32>
    %34 = arith.cmpi sge, %7, %33 : vector<1x128xi32>
    %cst_12 = arith.constant 0.000000e+00 : f32
    %35 = vector.broadcast %cst_12 : f32 to vector<1x128xf32>
    %36 = arith.select %34, %32, %35 : vector<1x128xi1>, vector<1x128xf32>
    %37 = arith.addf %31, %36 : vector<1x128xf32>
    %c2_i32 = arith.constant 2 : i32
    %38 = tpu.dynamic_rotate %37 by %c2_i32 dim 1 : vector<1x128xf32>, i32 -> vector<1x128xf32>
    %c2_i32_13 = arith.constant 2 : i32
    %39 = vector.broadcast %c2_i32_13 : i32 to vector<1x128xi32>
    %40 = arith.cmpi sge, %7, %39 : vector<1x128xi32>
    %cst_14 = arith.constant 0.000000e+00 : f32
    %41 = vector.broadcast %cst_14 : f32 to vector<1x128xf32>
    %42 = arith.select %40, %38, %41 : vector<1x128xi1>, vector<1x128xf32>
    %43 = arith.addf %37, %42 : vector<1x128xf32>
    %c4_i32 = arith.constant 4 : i32
    %44 = tpu.dynamic_rotate %43 by %c4_i32 dim 1 : vector<1x128xf32>, i32 -> vector<1x128xf32>
    %c4_i32_15 = arith.constant 4 : i32
    %45 = vector.broadcast %c4_i32_15 : i32 to vector<1x128xi32>
    %46 = arith.cmpi sge, %7, %45 : vector<1x128xi32>
    %cst_16 = arith.constant 0.000000e+00 : f32
    %47 = vector.broadcast %cst_16 : f32 to vector<1x128xf32>
    %48 = arith.select %46, %44, %47 : vector<1x128xi1>, vector<1x128xf32>
    %49 = arith.addf %43, %48 : vector<1x128xf32>
    %c8_i32 = arith.constant 8 : i32
    %50 = tpu.dynamic_rotate %49 by %c8_i32 dim 1 : vector<1x128xf32>, i32 -> vector<1x128xf32>
    %c8_i32_17 = arith.constant 8 : i32
    %51 = vector.broadcast %c8_i32_17 : i32 to vector<1x128xi32>
    %52 = arith.cmpi sge, %7, %51 : vector<1x128xi32>
    %cst_18 = arith.constant 0.000000e+00 : f32
    %53 = vector.broadcast %cst_18 : f32 to vector<1x128xf32>
    %54 = arith.select %52, %50, %53 : vector<1x128xi1>, vector<1x128xf32>
    %55 = arith.addf %49, %54 : vector<1x128xf32>
    %c16_i32 = arith.constant 16 : i32
    %56 = tpu.dynamic_rotate %55 by %c16_i32 dim 1 : vector<1x128xf32>, i32 -> vector<1x128xf32>
    %c16_i32_19 = arith.constant 16 : i32
    %57 = vector.broadcast %c16_i32_19 : i32 to vector<1x128xi32>
    %58 = arith.cmpi sge, %7, %57 : vector<1x128xi32>
    %cst_20 = arith.constant 0.000000e+00 : f32
    %59 = vector.broadcast %cst_20 : f32 to vector<1x128xf32>
    %60 = arith.select %58, %56, %59 : vector<1x128xi1>, vector<1x128xf32>
    %61 = arith.addf %55, %60 : vector<1x128xf32>
    %c32_i32 = arith.constant 32 : i32
    %62 = tpu.dynamic_rotate %61 by %c32_i32 dim 1 : vector<1x128xf32>, i32 -> vector<1x128xf32>
    %c32_i32_21 = arith.constant 32 : i32
    %63 = vector.broadcast %c32_i32_21 : i32 to vector<1x128xi32>
    %64 = arith.cmpi sge, %7, %63 : vector<1x128xi32>
    %cst_22 = arith.constant 0.000000e+00 : f32
    %65 = vector.broadcast %cst_22 : f32 to vector<1x128xf32>
    %66 = arith.select %64, %62, %65 : vector<1x128xi1>, vector<1x128xf32>
    %67 = arith.addf %61, %66 : vector<1x128xf32>
    %68 = arith.subf %67, %31 : vector<1x128xf32>
    %69 = arith.cmpi eq, %11, %10 : vector<64x128xi32>
    %cst_23 = arith.constant 0.000000e+00 : f32
    %70 = vector.shape_cast %68 : vector<1x128xf32> to vector<1x128xf32>
    %71 = vector.broadcast %70 : vector<1x128xf32> to vector<64x128xf32>
    %72 = vector.broadcast %cst_23 : f32 to vector<64x128xf32>
    %73 = arith.select %69, %71, %72 : vector<64x128xi1>, vector<64x128xf32>
    %cst_24 = arith.constant dense<0.000000e+00> : vector<64xf32>
    %74 = vector.multi_reduction <add>, %73, %cst_24 [1] : vector<64x128xf32> to vector<64xf32>
    %75 = vector.shape_cast %74 : vector<64xf32> to vector<64x1xf32>
    %c64_i32_25 = arith.constant 64 : i32
    %76 = vector.broadcast %c64_i32_25 : i32 to vector<64x128xi32>
    %77 = arith.addi %10, %76 : vector<64x128xi32>
    %78 = arith.cmpi eq, %11, %77 : vector<64x128xi32>
    %cst_26 = arith.constant 0.000000e+00 : f32
    %79 = vector.shape_cast %68 : vector<1x128xf32> to vector<1x128xf32>
    %80 = vector.broadcast %79 : vector<1x128xf32> to vector<64x128xf32>
    %81 = vector.broadcast %cst_26 : f32 to vector<64x128xf32>
    %82 = arith.select %78, %80, %81 : vector<64x128xi1>, vector<64x128xf32>
    %cst_27 = arith.constant dense<0.000000e+00> : vector<64xf32>
    %83 = vector.multi_reduction <add>, %82, %cst_27 [1] : vector<64x128xf32> to vector<64xf32>
    %84 = vector.shape_cast %83 : vector<64xf32> to vector<64x1xf32>
    %85 = vector.shape_cast %75 : vector<64x1xf32> to vector<64x1xf32>
    %86 = vector.broadcast %85 : vector<64x1xf32> to vector<64x128xf32>
    %87 = vector.shape_cast %84 : vector<64x1xf32> to vector<64x1xf32>
    %88 = vector.broadcast %87 : vector<64x1xf32> to vector<64x128xf32>
    %89 = arith.select %19, %86, %88 : vector<64x128xi1>, vector<64x128xf32>
    %90 = vector.broadcast %67 : vector<1x128xf32> to vector<64x128xf32>
    %91 = arith.subf %90, %89 : vector<64x128xf32>
    %92 = arith.mulf %91, %27 : vector<64x128xf32>
    %cst_28 = arith.constant 0xFF800000 : f32
    %93 = vector.broadcast %cst_28 : f32 to vector<64x128xf32>
    %94 = arith.select %17, %92, %93 : vector<64x128xi1>, vector<64x128xf32>
    %c127_i32 = arith.constant 127 : i32
    %95 = tpu.dynamic_rotate %94 by %c127_i32 dim 1 : vector<64x128xf32>, i32 -> vector<64x128xf32>
    %c63_i32 = arith.constant 63 : i32
    %96 = vector.broadcast %c63_i32 : i32 to vector<64x128xi32>
    %97 = arith.cmpi slt, %16, %96 : vector<64x128xi32>
    %cst_29 = arith.constant 0xFF800000 : f32
    %98 = vector.broadcast %cst_29 : f32 to vector<64x128xf32>
    %99 = arith.select %97, %95, %98 : vector<64x128xi1>, vector<64x128xf32>
    %100 = arith.maximumf %94, %99 : vector<64x128xf32>
    %c126_i32 = arith.constant 126 : i32
    %101 = tpu.dynamic_rotate %100 by %c126_i32 dim 1 : vector<64x128xf32>, i32 -> vector<64x128xf32>
    %c62_i32 = arith.constant 62 : i32
    %102 = vector.broadcast %c62_i32 : i32 to vector<64x128xi32>
    %103 = arith.cmpi slt, %16, %102 : vector<64x128xi32>
    %cst_30 = arith.constant 0xFF800000 : f32
    %104 = vector.broadcast %cst_30 : f32 to vector<64x128xf32>
    %105 = arith.select %103, %101, %104 : vector<64x128xi1>, vector<64x128xf32>
    %106 = arith.maximumf %100, %105 : vector<64x128xf32>
    %c124_i32 = arith.constant 124 : i32
    %107 = tpu.dynamic_rotate %106 by %c124_i32 dim 1 : vector<64x128xf32>, i32 -> vector<64x128xf32>
    %c60_i32 = arith.constant 60 : i32
    %108 = vector.broadcast %c60_i32 : i32 to vector<64x128xi32>
    %109 = arith.cmpi slt, %16, %108 : vector<64x128xi32>
    %cst_31 = arith.constant 0xFF800000 : f32
    %110 = vector.broadcast %cst_31 : f32 to vector<64x128xf32>
    %111 = arith.select %109, %107, %110 : vector<64x128xi1>, vector<64x128xf32>
    %112 = arith.maximumf %106, %111 : vector<64x128xf32>
    %c120_i32 = arith.constant 120 : i32
    %113 = tpu.dynamic_rotate %112 by %c120_i32 dim 1 : vector<64x128xf32>, i32 -> vector<64x128xf32>
    %c56_i32 = arith.constant 56 : i32
    %114 = vector.broadcast %c56_i32 : i32 to vector<64x128xi32>
    %115 = arith.cmpi slt, %16, %114 : vector<64x128xi32>
    %cst_32 = arith.constant 0xFF800000 : f32
    %116 = vector.broadcast %cst_32 : f32 to vector<64x128xf32>
    %117 = arith.select %115, %113, %116 : vector<64x128xi1>, vector<64x128xf32>
    %118 = arith.maximumf %112, %117 : vector<64x128xf32>
    %c112_i32 = arith.constant 112 : i32
    %119 = tpu.dynamic_rotate %118 by %c112_i32 dim 1 : vector<64x128xf32>, i32 -> vector<64x128xf32>
    %c48_i32 = arith.constant 48 : i32
    %120 = vector.broadcast %c48_i32 : i32 to vector<64x128xi32>
    %121 = arith.cmpi slt, %16, %120 : vector<64x128xi32>
    %cst_33 = arith.constant 0xFF800000 : f32
    %122 = vector.broadcast %cst_33 : f32 to vector<64x128xf32>
    %123 = arith.select %121, %119, %122 : vector<64x128xi1>, vector<64x128xf32>
    %124 = arith.maximumf %118, %123 : vector<64x128xf32>
    %c96_i32 = arith.constant 96 : i32
    %125 = tpu.dynamic_rotate %124 by %c96_i32 dim 1 : vector<64x128xf32>, i32 -> vector<64x128xf32>
    %c32_i32_34 = arith.constant 32 : i32
    %126 = vector.broadcast %c32_i32_34 : i32 to vector<64x128xi32>
    %127 = arith.cmpi slt, %16, %126 : vector<64x128xi32>
    %cst_35 = arith.constant 0xFF800000 : f32
    %128 = vector.broadcast %cst_35 : f32 to vector<64x128xf32>
    %129 = arith.select %127, %125, %128 : vector<64x128xi1>, vector<64x128xf32>
    %130 = arith.maximumf %124, %129 : vector<64x128xf32>
    %cst_36 = arith.constant 0x7F800000 : f32
    %131 = vector.broadcast %cst_36 : f32 to vector<64x128xf32>
    %132 = arith.select %17, %130, %131 : vector<64x128xi1>, vector<64x128xf32>
    %cst_37 = arith.constant dense<0x7F800000> : vector<128xf32>
    %133 = vector.multi_reduction <minimumf>, %132, %cst_37 [0] : vector<64x128xf32> to vector<128xf32>
    %134 = vector.shape_cast %133 : vector<128xf32> to vector<1x128xf32>
    %135 = arith.subf %0, %134 : vector<1x128xf32>
    %136 = vector.shape_cast %135 : vector<1x128xf32> to vector<1x1x128xf32>
    %cst_38 = arith.constant dense<0.000000e+00> : vector<1xf32>
    %137 = vector.multi_reduction <add>, %136, %cst_38 [1, 2] : vector<1x1x128xf32> to vector<1xf32>
    %138 = vector.shape_cast %137 : vector<1xf32> to vector<1x1x1xf32>
    %139 = vector.extract %138[0, 0, 0] : f32 from vector<1x1x1xf32>
    %140 = vector.broadcast %139 : f32 to vector<1x1xf32>
    %cst_39 = arith.constant 0.000000e+00 : f32
    %141 = vector.broadcast %cst_39 : f32 to vector<1x128xf32>
    %142 = arith.select %9, %135, %141 : vector<1x128xi1>, vector<1x128xf32>
    %143 = vector.shape_cast %142 : vector<1x128xf32> to vector<1x1x128xf32>
    %cst_40 = arith.constant dense<0.000000e+00> : vector<1xf32>
    %144 = vector.multi_reduction <add>, %143, %cst_40 [1, 2] : vector<1x1x128xf32> to vector<1xf32>
    %145 = vector.shape_cast %144 : vector<1xf32> to vector<1x1x1xf32>
    %146 = vector.extract %145[0, 0, 0] : f32 from vector<1x1x1xf32>
    %147 = vector.broadcast %146 : f32 to vector<1x1xf32>
    %148 = arith.subf %140, %147 : vector<1x1xf32>
    %149 = vector.shape_cast %147 : vector<1x1xf32> to vector<1x1xf32>
    %150 = vector.broadcast %149 : vector<1x1xf32> to vector<1x128xf32>
    %151 = vector.shape_cast %148 : vector<1x1xf32> to vector<1x1xf32>
    %152 = vector.broadcast %151 : vector<1x1xf32> to vector<1x128xf32>
    %153 = arith.select %9, %150, %152 : vector<1x128xi1>, vector<1x128xf32>
    %cst_41 = arith.constant 1.562500e-02 : f32
    %154 = vector.broadcast %cst_41 : f32 to vector<1x128xf32>
    %155 = arith.mulf %153, %154 : vector<1x128xf32>
    %156 = arith.subf %135, %155 : vector<1x128xf32>
    %157 = arith.mulf %156, %156 : vector<1x128xf32>
    %158 = vector.shape_cast %157 : vector<1x128xf32> to vector<1x1x128xf32>
    %cst_42 = arith.constant dense<0.000000e+00> : vector<1xf32>
    %159 = vector.multi_reduction <add>, %158, %cst_42 [1, 2] : vector<1x1x128xf32> to vector<1xf32>
    %160 = vector.shape_cast %159 : vector<1xf32> to vector<1x1x1xf32>
    %161 = vector.extract %160[0, 0, 0] : f32 from vector<1x1x1xf32>
    %162 = vector.broadcast %161 : f32 to vector<1x1xf32>
    %cst_43 = arith.constant 0.000000e+00 : f32
    %163 = vector.broadcast %cst_43 : f32 to vector<1x128xf32>
    %164 = arith.select %9, %157, %163 : vector<1x128xi1>, vector<1x128xf32>
    %165 = vector.shape_cast %164 : vector<1x128xf32> to vector<1x1x128xf32>
    %cst_44 = arith.constant dense<0.000000e+00> : vector<1xf32>
    %166 = vector.multi_reduction <add>, %165, %cst_44 [1, 2] : vector<1x1x128xf32> to vector<1xf32>
    %167 = vector.shape_cast %166 : vector<1xf32> to vector<1x1x1xf32>
    %168 = vector.extract %167[0, 0, 0] : f32 from vector<1x1x1xf32>
    %169 = vector.broadcast %168 : f32 to vector<1x1xf32>
    %170 = arith.subf %162, %169 : vector<1x1xf32>
    %171 = vector.broadcast %1 : vector<1x128xi32> to vector<64x128xi32>
    %172 = arith.cmpi eq, %10, %171 : vector<64x128xi32>
    %cst_45 = arith.constant 0.000000e+00 : f32
    %173 = vector.shape_cast %156 : vector<1x128xf32> to vector<1x128xf32>
    %174 = vector.broadcast %173 : vector<1x128xf32> to vector<64x128xf32>
    %175 = vector.broadcast %cst_45 : f32 to vector<64x128xf32>
    %176 = arith.select %172, %174, %175 : vector<64x128xi1>, vector<64x128xf32>
    %cst_46 = arith.constant dense<0.000000e+00> : vector<64xf32>
    %177 = vector.multi_reduction <add>, %176, %cst_46 [1] : vector<64x128xf32> to vector<64xf32>
    %178 = vector.shape_cast %177 : vector<64xf32> to vector<64x1xf32>
    %179 = arith.mulf %178, %178 : vector<64x1xf32>
    %180 = vector.shape_cast %179 : vector<64x1xf32> to vector<1x64x1xf32>
    %cst_47 = arith.constant dense<0.000000e+00> : vector<1xf32>
    %181 = vector.multi_reduction <add>, %180, %cst_47 [1, 2] : vector<1x64x1xf32> to vector<1xf32>
    %182 = vector.shape_cast %181 : vector<1xf32> to vector<1x1x1xf32>
    %183 = vector.extract %182[0, 0, 0] : f32 from vector<1x1x1xf32>
    %184 = vector.broadcast %183 : f32 to vector<1x1xf32>
    %185 = arith.subf %184, %169 : vector<1x1xf32>
    %186 = arith.subf %185, %170 : vector<1x1xf32>
    %cst_48 = arith.constant 5.000000e-01 : f32
    %187 = vector.broadcast %cst_48 : f32 to vector<1x1xf32>
    %188 = arith.mulf %187, %186 : vector<1x1xf32>
    %189 = arith.mulf %169, %170 : vector<1x1xf32>
    %190 = math.rsqrt %189 : vector<1x1xf32>
    %191 = arith.mulf %188, %190 : vector<1x1xf32>
    %cst_49 = arith.constant 0.000000e+00 : f32
    %192 = vector.broadcast %cst_49 : f32 to vector<1x1xf32>
    %193 = arith.subf %192, %191 : vector<1x1xf32>
    %c0_50 = arith.constant 0 : index
    %c0_51 = arith.constant 0 : index
    %194 = vector.load %arg3[%c0_50, %c0_51] : memref<1x1xf32, #tpu.memory_space<vmem>>, vector<1x1xf32>
    tpu.vector_store %arg3[%c0_50, %c0_51], %193 {strides = array<i32>} : memref<1x1xf32, #tpu.memory_space<vmem>>, vector<1x1xf32>,
    return
  }
  func.func @transform_0(%arg0: i32) -> (i32, i32) {
    %c0_i32 = arith.constant 0 : i32
    %c0_i32_0 = arith.constant 0 : i32
    %c0_i32_1 = arith.constant 0 : i32
    return %c0_i32, %c0_i32_0 : i32, i32
  }
  func.func @transform_1(%arg0: i32) -> (i32, i32) {
    %c0_i32 = arith.constant 0 : i32
    %c0_i32_0 = arith.constant 0 : i32
    %c0_i32_1 = arith.constant 0 : i32
    return %c0_i32, %c0_i32_0 : i32, i32
  }
  func.func @transform_2(%arg0: i32) -> (i32, i32) {
    %c0_i32 = arith.constant 0 : i32
    %c0_i32_0 = arith.constant 0 : i32
    %c0_i32_1 = arith.constant 0 : i32
    return %c0_i32, %c0_i32_0 : i32, i32
  }
}

</mosaic_0001>

<bundles_post_ra>
// kernel: _lambda_.1
= control target key start
LH: loop header
LB: loop body
LE: loop exit
PB: predicated region body
PF: predicated region fallthrough
CT: control target
= control target key end

     0   :  { %v14_v0 = vlaneseq  ;;  %s1057_s0 = inlined_call_operand.vmem [shape: f32[1,128], index: 0, kind: input, shape index: {}]   ;;  %s1058_s1 = inlined_call_operand.vmem [shape: s32[1,128], index: 1, kind: input, shape index: {}]   ;;  %s1059_s2 = inlined_call_operand.hbm [shape: f32[1,1], index: 2, kind: output, shape index: {}]  }
   0x1   :  { %7 = vsyncpa [#allocation3], 0  ;;  %v721_v5 = vld [vmem:[%s1057_s0] sm:$0x1]  ;;  %s682_s11 = smov 1   ;;  %s683_s12 = smov 2  }
   0x2   :  { %v710_v1 = vand.u32 127, %v14_v0  ;;  %s684_s13 = smov 4   ;;  %s685_s0 = smov 8   ;;  %v730_v23 = vshrl.u32 %v14_v0, 7 }
   0x3   :  { %s686_s14 = smov 16   ;;  %s687_s15 = smov 32  }
   0x4   :  { %vm16_vm0 = vcmp.ge.s32.totalorder %v710_v1, 64  ;;  %v615_v2 = vadd.s32 4294967232, %v710_v1  ;;  %v735_v27 = vadd.s32 8, %v730_v23  ;;  %v738_v28 = vsub.s32 0, %v730_v23  ;;  %s688_s16 = smov 127   ;;  %s689_s17 = smov 126  }
   0x5   :  { %vm127_vm8 = vcmp.eq.s32.totalorder %v710_v1, %v730_v23  ;;  %v747_v31 = vadd.s32 32, %v730_v23  ;;  %v750_v32 = vadd.s32 16, %v730_v23  ;;  %v757_v35 = vadd.s32 48, %v730_v23  ;;  %s690_s18 = smov 124   ;;  %s691_s19 = smov 120  }
   0x6   :  { %v715_v3 = vsel %vm16_vm0, %v615_v2, %v710_v1  ;;  %vm128_vm7 = vcmp.eq.s32.totalorder %v710_v1, %v735_v27  ;;  %v760_v36 = vadd.s32 24, %v730_v23  ;;  %v165_v39 = vadd.s32 64, %v730_v23  ;;  %s692_s20 = smov 112   ;;  %s693_s21 = smov 96  }
   0x7   :  { %v93_v4 = vsub.s32 64, %v715_v3  ;;  %vm98_vm1 = vcmp.ge.s32.totalorder %v715_v3, 1  ;;  %vm103_vm2 = vcmp.ge.s32.totalorder %v715_v3, 2  ;;  %vm108_vm3 = vcmp.ge.s32.totalorder %v715_v3, 4  ;;  %s694_s28 = smov [#allocation2]  }
   0x8   :  { %vm113_vm4 = vcmp.ge.s32.totalorder %v715_v3, 8  ;;  %vm118_vm5 = vcmp.ge.s32.totalorder %v715_v3, 16  ;;  %vm123_vm6 = vcmp.ge.s32.totalorder %v715_v3, 32  ;;  %vm131_vm9 = vcmp.eq.s32.totalorder %v710_v1, %v747_v31  ;;  %s607_s29 = sshll.u32 %s694_s28, 4  ;;  %s608_s29 = int_to_ptr.vmem [resolvable:$true] %s607_s29 }
   0x9   :  { %v94_v6 = vcvt.s32.f32 %v93_v4  ;;  %vm129_vm10 = vcmp.eq.s32.totalorder %v710_v1, %v750_v32  ;;  %vm133_vm11 = vcmp.eq.s32.totalorder %v710_v1, %v757_v35  ;;  %vm130_vm12 = vcmp.eq.s32.totalorder %v710_v1, %v760_v36  ;;  %s658_s30 = scalar_lea.vmem %s608_s29, 16  ;;  %s662_s3 = scalar_lea.vmem %s608_s29, 32 }
   0xa   :  { %v768_v40 = vadd.s32 40, %v730_v23  ;;  %vm173_vm13 = vcmp.eq.s32.totalorder %v710_v1, %v165_v39  ;;  %v167_v43 = vadd.s32 64, %v750_v32  ;;  %v775_v44 = vadd.s32 56, %v730_v23  ;;  %p659_p0 = scmp.ne.s32.totalorder %s608_s29, %s658_s30  ;;  %p663_p1 = scmp.lt.s32.totalorder %s608_s29, %s608_s29 }
   0xb   :  { %v95_v7 = vsub.f32 %v721_v5, %v94_v6  ;;  %v169_v47 = vadd.s32 64, %v747_v31  ;;  %v166_v48 = vadd.s32 64, %v735_v27  ;;  %v171_v51 = vadd.s32 64, %v757_v35  ;;  %p664_p2 = scmp.lt.s32.totalorder %s662_s3, %s658_s30 }
   0xc   :  { %vm132_vm14 = vcmp.eq.s32.totalorder %v710_v1, %v768_v40  ;;  %vm175_vm15 = vcmp.eq.s32.totalorder %v710_v1, %v167_v43  ;;  %vm134_vm0 = vcmp.eq.s32.totalorder %v710_v1, %v775_v44  ;;  %v168_v52 = vadd.s32 64, %v760_v36 }
   0xd   :  { %96 = vrot.lane.b32.xlu0 %v95_v7, %s682_s11  ;;  %v170_v55 = vadd.s32 64, %v768_v40  ;;  %v172_v58 = vadd.s32 64, %v775_v44  ;;  %v37_v61 = vsub.s32 %v715_v3, %v730_v23  ;;  %v39_v63 = vsub.s32 %v715_v3, %v750_v32  ;;  %p665_p3 = por %p664_p2, %p663_p1 }
   0xe   :  { %v38_v2 = vsub.s32 %v715_v3, %v735_v27  ;;  %v41_v4 = vsub.s32 %v715_v3, %v747_v31 }
   0xf   :  { %v45_v62 = vadd.s32 1, %v37_v61  ;;  %v47_v0 = vadd.s32 1, %v39_v63  ;;  %p666_p4 = pnand %p665_p3, %p659_p0 }
  0x7f   :  { %v97_v8 = vpop.permute.xlu0 %96 }
  0x80   :  { %v99_v9 = vsel %vm98_vm1, %v97_v8, 0.0  ;;  %vm177_vm1 = vcmp.eq.s32.totalorder %v710_v1, %v169_v47  ;;  %v40_v8 = vsub.s32 %v715_v3, %v760_v36 }
  0x81   :  { %v100_v10 = vadd.f32 %v99_v9, %v95_v7 }
  0x83   :  { %101 = vrot.lane.b32.xlu0 %v100_v10, %s683_s12 }
  0xf5   :  { %v102_v11 = vpop.permute.xlu0 %101 }
  0xf6   :  { %v104_v12 = vsel %vm103_vm2, %v102_v11, 0.0  ;;  %vm174_vm2 = vcmp.eq.s32.totalorder %v710_v1, %v166_v48  ;;  %v43_v11 = vsub.s32 %v715_v3, %v757_v35 }
  0xf7   :  { %v105_v13 = vadd.f32 %v104_v12, %v100_v10  ;;  %v49_v10 = vadd.s32 1, %v41_v4 }
  0xf9   :  { %106 = vrot.lane.b32.xlu1 %v105_v13, %s684_s13 }
 0x16b   :  { %v107_v14 = vpop.permute.xlu1 %106 }
 0x16c   :  { %v109_v15 = vsel %vm108_vm3, %v107_v14, 0.0  ;;  %vm179_vm3 = vcmp.eq.s32.totalorder %v710_v1, %v171_v51 }
 0x16d   :  { %v110_v16 = vadd.f32 %v109_v15, %v105_v13  ;;  %v48_v15 = vadd.s32 1, %v40_v8 }
 0x16f   :  { %111 = vrot.lane.b32.xlu1 %v110_v16, %s685_s0 }
 0x1e1   :  { %v112_v17 = vpop.permute.xlu1 %111 }
 0x1e2   :  { %v114_v18 = vsel %vm113_vm4, %v112_v17, 0.0  ;;  %vm176_vm4 = vcmp.eq.s32.totalorder %v710_v1, %v168_v52 }
 0x1e3   :  { %v115_v19 = vadd.f32 %v114_v18, %v110_v16  ;;  %v42_v16 = vsub.s32 %v715_v3, %v768_v40  ;;  %v51_v18 = vadd.s32 1, %v43_v11 }
 0x1e5   :  { %116 = vrot.lane.b32.xlu0 %v115_v19, %s686_s14 }
 0x257   :  { %v117_v20 = vpop.permute.xlu0 %116 }
 0x258   :  { %v119_v21 = vsel %vm118_vm5, %v117_v20, 0.0  ;;  %vm178_vm5 = vcmp.eq.s32.totalorder %v710_v1, %v170_v55 }
 0x259   :  { %v120_v22 = vadd.f32 %v119_v21, %v115_v19 }
 0x25b   :  { %121 = vrot.lane.b32.xlu1 %v120_v22, %s687_s15 }
 0x2cd   :  { %v122_v24 = vpop.permute.xlu1 %121 }
 0x2ce   :  { %v124_v25 = vsel %vm123_vm6, %v122_v24, 0.0  ;;  %vm180_vm6 = vcmp.eq.s32.totalorder %v710_v1, %v172_v58  ;;  %v44_v24 = vsub.s32 %v715_v3, %v775_v44 }
 0x2cf   :  { %v732_v26 = vadd.f32 %v124_v25, %v120_v22  ;;  %v50_v22 = vadd.s32 1, %v42_v16 }
 0x2d1   :  { %v126_v29 = vsub.f32 %v732_v26, %v95_v7  ;;  %v46_v7 = vadd.s32 1, %v38_v2 }
 0x2d3   :  { %v139_v30 = vrot.slane %v126_v29, %v738_v28 }
 0x2d5   :  { %v142_v33 = vsel %vm128_vm7, %v139_v30, 0.0  ;;  %v141_v34 = vsel %vm127_vm8, %v139_v30, 0.0  ;;  %v145_v37 = vsel %vm131_vm9, %v139_v30, 0.0  ;;  %v143_v38 = vsel %vm129_vm10, %v139_v30, 0.0 }
 0x2d6   :  { %151 = vadd.xlane.f32.xlu1 %v142_v33  ;;  %149 = vadd.xlane.f32.xlu0 %v141_v34  ;;  %v147_v41 = vsel %vm133_vm11, %v139_v30, 0.0  ;;  %v144_v42 = vsel %vm130_vm12, %v139_v30, 0.0  ;;  %v181_v45 = vsel %vm173_vm13, %v139_v30, 0.0  ;;  %v146_v46 = vsel %vm132_vm14, %v139_v30, 0.0 }
 0x2d7   :  { %v183_v49 = vsel %vm175_vm15, %v139_v30, 0.0  ;;  %v148_v50 = vsel %vm134_vm0, %v139_v30, 0.0  ;;  %v185_v53 = vsel %vm177_vm1, %v139_v30, 0.0  ;;  %v182_v54 = vsel %vm174_vm2, %v139_v30, 0.0 }
 0x2d8   :  { %v187_v56 = vsel %vm179_vm3, %v139_v30, 0.0  ;;  %v184_v57 = vsel %vm176_vm4, %v139_v30, 0.0  ;;  %v186_v59 = vsel %vm178_vm5, %v139_v30, 0.0  ;;  %v188_v60 = vsel %vm180_vm6, %v139_v30, 0.0 }
 0x2d9   :  { %vm53_vm7 = vcmp.gt.s32.totalorder %v45_v62, 1  ;;  %vm57_vm8 = vcmp.gt.s32.totalorder %v47_v0, 1  ;;  %vm55_vm9 = vcmp.gt.s32.totalorder %v46_v7, 1  ;;  %vm61_vm10 = vcmp.gt.s32.totalorder %v49_v10, 1 }
 0x2da   :  { %157 = vadd.xlane.f32.xlu1 %v145_v37  ;;  %153 = vadd.xlane.f32.xlu0 %v143_v38  ;;  %v54_v6 = vsel %vm53_vm7, %v45_v62, 1  ;;  %v58_v14 = vsel %vm57_vm8, %v47_v0, 1  ;;  %v56_v21 = vsel %vm55_vm9, %v46_v7, 1  ;;  %vm59_vm11 = vcmp.gt.s32.totalorder %v48_v15, 1 }
 0x2db   :  { %v69_v9 = vcvt.s32.f32 %v54_v6  ;;  %v71_v17 = vcvt.s32.f32 %v58_v14  ;;  %v62_v25 = vsel %vm61_vm10, %v49_v10, 1  ;;  %v70_v29 = vcvt.s32.f32 %v56_v21 }
 0x2dc   :  { %vm65_vm12 = vcmp.gt.s32.totalorder %v51_v18, 1  ;;  %v60_v34 = vsel %vm59_vm11, %v48_v15, 1  ;;  %v73_v37 = vcvt.s32.f32 %v62_v25  ;;  %vm63_vm13 = vcmp.gt.s32.totalorder %v50_v22, 1 }
 0x2dd   :  { %640 = vrcp.f32 %v69_v9  ;;  %v52_v38 = vadd.s32 1, %v44_v24  ;;  %vm19_vm14 = vcmp.lt.s32.totalorder %v710_v1, 64  ;;  %v66_v39 = vsel %vm65_vm12, %v51_v18, 1 }
 0x2de   :  { %161 = vadd.xlane.f32.xlu1 %v147_v41  ;;  %155 = vadd.xlane.f32.xlu0 %v144_v42  ;;  %642 = vrcp.f32 %v71_v17  ;;  %v72_v41 = vcvt.s32.f32 %v60_v34  ;;  %v813_v42 = vrot.slane %v732_v26, %v738_v28  ;;  %vm29_vm0 = vcmp.le.s32.totalorder %v730_v23, %v715_v3 }
 0x2df   :  { %644 = vrcp.f32 %v70_v29  ;;  %vm67_vm15 = vcmp.gt.s32.totalorder %v52_v38, 1  ;;  %vm31_vm1 = vcmp.le.s32.totalorder %v750_v32, %v715_v3  ;;  %vm30_vm2 = vcmp.le.s32.totalorder %v735_v27, %v715_v3 }
 0x2e0   :  { %646 = vrcp.f32 %v73_v37  ;;  %vm33_vm3 = vcmp.le.s32.totalorder %v747_v31, %v715_v3  ;;  %vm32_vm4 = vcmp.le.s32.totalorder %v760_v36, %v715_v3  ;;  %vm35_vm5 = vcmp.le.s32.totalorder %v757_v35, %v715_v3 }
 0x2e1   :  { %648 = vrcp.f32 %v72_v41  ;;  %vm34_vm6 = vcmp.le.s32.totalorder %v768_v40, %v715_v3  ;;  %vm36_vm7 = vcmp.le.s32.totalorder %v775_v44, %v715_v3  ;;  %vm259_vm8 = vcmp.lt.s32.totalorder %v715_v3, 63 }
 0x2e2   :  { %189 = vadd.xlane.f32.xlu1 %v181_v45  ;;  %159 = vadd.xlane.f32.xlu0 %v146_v46  ;;  %v64_v46 = vsel %vm63_vm13, %v50_v22, 1  ;;  %vm292_vm9 = vcmp.lt.s32.totalorder %v715_v3, 62  ;;  %vm325_vm10 = vcmp.lt.s32.totalorder %v715_v3, 60  ;;  %vm358_vm11 = vcmp.lt.s32.totalorder %v715_v3, 56 }
 0x2e3   :  { %v74_v51 = vcvt.s32.f32 %v64_v46  ;;  %vm391_vm12 = vcmp.lt.s32.totalorder %v715_v3, 48  ;;  %vm424_vm13 = vcmp.lt.s32.totalorder %v715_v3, 32 }
 0x2e6   :  { %193 = vadd.xlane.f32.xlu1 %v183_v49  ;;  %163 = vadd.xlane.f32.xlu0 %v148_v50  ;;  %v75_v49 = vcvt.s32.f32 %v66_v39 }
 0x2e7   :  { %v641_v47 = vpop.eup %640 }
 0x2e8   :  { %v643_v55 = vpop.eup %642  ;;  %650 = vrcp.f32 %v75_v49 }
 0x2e9   :  { %652 = vrcp.f32 %v74_v51  ;;  %v645_v63 = vpop.eup %644 }
 0x2ea   :  { %197 = vadd.xlane.f32.xlu1 %v185_v53  ;;  %191 = vadd.xlane.f32.xlu0 %v182_v54  ;;  %v68_v54 = vsel %vm67_vm15, %v52_v38, 1  ;;  %v647_v8 = vpop.eup %646  ;;  %vm463_vm15 = vcmask 1040384  }
 0x2ee   :  { %201 = vadd.xlane.f32.xlu1 %v187_v56  ;;  %195 = vadd.xlane.f32.xlu0 %v184_v57 }
 0x2f2   :  { %199 = vadd.xlane.f32.xlu0 %v186_v59  ;;  %v76_v59 = vcvt.s32.f32 %v68_v54 }
 0x2f4   :  { %654 = vrcp.f32 %v76_v59 }
 0x2f6   :  { %203 = vadd.xlane.f32.xlu0 %v188_v60 }
 0x363   :  { %v804_v12 = vpop.xlane.xlu1 %151  ;;  %v150_v13 = vpop.xlane.xlu0 %149 }
 0x367   :  { %v158_v19 = vpop.xlane.xlu1 %157  ;;  %v154_v20 = vpop.xlane.xlu0 %153 }
 0x36b   :  { %v162_v30 = vpop.xlane.xlu1 %161  ;;  %v156_v33 = vpop.xlane.xlu0 %155 }
 0x36f   :  { %v190_v43 = vpop.xlane.xlu1 %189  ;;  %v160_v45 = vpop.xlane.xlu0 %159 }
 0x370   :  { %v205_v48 = vsel %vm19_vm14, %v150_v13, %v190_v43  ;;  %v649_v13 = vpop.eup %648 }
 0x371   :  { %v219_v50 = vsub.f32 %v813_v42, %v205_v48 }
 0x373   :  { %v194_v52 = vpop.xlane.xlu1 %193  ;;  %v164_v26 = vpop.xlane.xlu0 %163  ;;  %v227_v53 = vmul.f32 %v641_v47, %v219_v50 }
 0x374   :  { %v207_v56 = vsel %vm19_vm14, %v154_v20, %v194_v52 }
 0x375   :  { %v221_v57 = vsub.f32 %v813_v42, %v207_v56  ;;  %v235_v58 = vsel %vm29_vm0, %v227_v53, -inf }
 0x376   :  { %243 = vrot.lane.b32.xlu1 %v235_v58, %s688_s16 }
 0x377   :  { %v198_v60 = vpop.xlane.xlu1 %197  ;;  %v192_v61 = vpop.xlane.xlu0 %191  ;;  %v229_v62 = vmul.f32 %v643_v55, %v221_v57 }
 0x378   :  { %v209_v0 = vsel %vm19_vm14, %v158_v19, %v198_v60  ;;  %v206_v2 = vsel %vm19_vm14, %v804_v12, %v192_v61  ;;  %v651_v19 = vpop.eup %650 }
 0x379   :  { %v223_v4 = vsub.f32 %v813_v42, %v209_v0  ;;  %v220_v6 = vsub.f32 %v813_v42, %v206_v2  ;;  %v237_v7 = vsel %vm31_vm1, %v229_v62, -inf  ;;  %v653_v22 = vpop.eup %652 }
 0x37a   :  { %247 = vrot.lane.b32.xlu1 %v237_v7, %s688_s16  ;;  %v655_v38 = vpop.eup %654 }
 0x37b   :  { %v202_v9 = vpop.xlane.xlu1 %201  ;;  %v196_v10 = vpop.xlane.xlu0 %195  ;;  %v228_v11 = vmul.f32 %v645_v63, %v220_v6  ;;  %v231_v18 = vmul.f32 %v647_v8, %v223_v4 }
 0x37c   :  { %v211_v12 = vsel %vm19_vm14, %v162_v30, %v202_v9  ;;  %v208_v14 = vsel %vm19_vm14, %v156_v33, %v196_v10 }
 0x37d   :  { %v225_v15 = vsub.f32 %v813_v42, %v211_v12  ;;  %v222_v16 = vsub.f32 %v813_v42, %v208_v14  ;;  %v236_v17 = vsel %vm30_vm2, %v228_v11, -inf  ;;  %v239_v29 = vsel %vm33_vm3, %v231_v18, -inf }
 0x37e   :  { %245 = vrot.lane.b32.xlu0 %v236_v17, %s688_s16 }
 0x37f   :  { %v200_v20 = vpop.xlane.xlu0 %199  ;;  %v230_v21 = vmul.f32 %v649_v13, %v222_v16  ;;  %v233_v33 = vmul.f32 %v651_v19, %v225_v15 }
 0x380   :  { %v210_v24 = vsel %vm19_vm14, %v160_v45, %v200_v20 }
 0x381   :  { %v224_v25 = vsub.f32 %v813_v42, %v210_v24  ;;  %v238_v30 = vsel %vm32_vm4, %v230_v21, -inf  ;;  %v241_v43 = vsel %vm35_vm5, %v233_v33, -inf }
 0x382   :  { %251 = vrot.lane.b32.xlu0 %v239_v29, %s688_s16  ;;  %249 = vrot.lane.b32.xlu1 %v238_v30, %s688_s16 }
 0x383   :  { %v204_v34 = vpop.xlane.xlu0 %203  ;;  %v232_v37 = vmul.f32 %v653_v22, %v224_v25 }
 0x384   :  { %v212_v39 = vsel %vm19_vm14, %v164_v26, %v204_v34 }
 0x385   :  { %v226_v41 = vsub.f32 %v813_v42, %v212_v39  ;;  %v240_v45 = vsel %vm34_vm6, %v232_v37, -inf }
 0x386   :  { %255 = vrot.lane.b32.xlu0 %v241_v43, %s688_s16  ;;  %253 = vrot.lane.b32.xlu1 %v240_v45, %s688_s16 }
 0x387   :  { %v234_v46 = vmul.f32 %v655_v38, %v226_v41 }
 0x389   :  { %v242_v42 = vsel %vm36_vm7, %v234_v46, -inf }
 0x38a   :  { %257 = vrot.lane.b32.xlu1 %v242_v42, %s688_s16 }
 0x3e8   :  { %v244_v47 = vpop.permute.xlu1 %243 }
 0x3e9   :  { %v260_v48 = vsel %vm259_vm8, %v244_v47, -inf }
 0x3ea   :  { %v268_v49 = vmax.f32 %v235_v58, %v260_v48 }
 0x3ec   :  { %v248_v50 = vpop.permute.xlu1 %247  ;;  %276 = vrot.lane.b32.xlu0 %v268_v49, %s689_s17 }
 0x3ed   :  { %v262_v51 = vsel %vm259_vm8, %v248_v50, -inf }
 0x3ee   :  { %v270_v52 = vmax.f32 %v237_v7, %v262_v51 }
 0x3f0   :  { %280 = vrot.lane.b32.xlu0 %v270_v52, %s689_s17  ;;  %v246_v26 = vpop.permute.xlu0 %245 }
 0x3f1   :  { %v261_v53 = vsel %vm259_vm8, %v246_v26, -inf }
 0x3f2   :  { %v269_v54 = vmax.f32 %v236_v17, %v261_v53 }
 0x3f4   :  { %v250_v55 = vpop.permute.xlu1 %249  ;;  %278 = vrot.lane.b32.xlu1 %v269_v54, %s689_s17  ;;  %v252_v56 = vpop.permute.xlu0 %251 }
 0x3f5   :  { %v263_v57 = vsel %vm259_vm8, %v250_v55, -inf  ;;  %v264_v58 = vsel %vm259_vm8, %v252_v56, -inf }
 0x3f6   :  { %v271_v59 = vmax.f32 %v238_v30, %v263_v57  ;;  %v272_v60 = vmax.f32 %v239_v29, %v264_v58 }
 0x3f8   :  { %v254_v61 = vpop.permute.xlu1 %253  ;;  %282 = vrot.lane.b32.xlu1 %v271_v59, %s689_s17  ;;  %284 = vrot.lane.b32.xlu0 %v272_v60, %s689_s17  ;;  %v256_v62 = vpop.permute.xlu0 %255 }
 0x3f9   :  { %v265_v63 = vsel %vm259_vm8, %v254_v61, -inf  ;;  %v266_v0 = vsel %vm259_vm8, %v256_v62, -inf }
 0x3fa   :  { %v273_v2 = vmax.f32 %v240_v45, %v265_v63  ;;  %v274_v4 = vmax.f32 %v241_v43, %v266_v0 }
 0x3fc   :  { %v258_v6 = vpop.permute.xlu1 %257  ;;  %286 = vrot.lane.b32.xlu1 %v273_v2, %s689_s17  ;;  %288 = vrot.lane.b32.xlu0 %v274_v4, %s689_s17 }
 0x3fd   :  { %v267_v7 = vsel %vm259_vm8, %v258_v6, -inf  ;;  %vm566_vm8 = vcmask 7168  }
 0x3fe   :  { %v275_v8 = vmax.f32 %v242_v42, %v267_v7 }
 0x400   :  { %290 = vrot.lane.b32.xlu1 %v275_v8, %s689_s17 }
 0x45e   :  { %v277_v9 = vpop.permute.xlu0 %276 }
 0x45f   :  { %v293_v10 = vsel %vm292_vm9, %v277_v9, -inf }
 0x460   :  { %v301_v11 = vmax.f32 %v268_v49, %v293_v10 }
 0x462   :  { %309 = vrot.lane.b32.xlu0 %v301_v11, %s690_s18  ;;  %v281_v13 = vpop.permute.xlu0 %280 }
 0x463   :  { %v295_v12 = vsel %vm292_vm9, %v281_v13, -inf }
 0x464   :  { %v303_v14 = vmax.f32 %v270_v52, %v295_v12 }
 0x466   :  { %v279_v15 = vpop.permute.xlu1 %278  ;;  %313 = vrot.lane.b32.xlu0 %v303_v14, %s690_s18 }
 0x467   :  { %v294_v16 = vsel %vm292_vm9, %v279_v15, -inf }
 0x468   :  { %v302_v17 = vmax.f32 %v269_v54, %v294_v16 }
 0x46a   :  { %311 = vrot.lane.b32.xlu1 %v302_v17, %s690_s18  ;;  %v283_v18 = vpop.permute.xlu1 %282  ;;  %v285_v19 = vpop.permute.xlu0 %284 }
 0x46b   :  { %v296_v20 = vsel %vm292_vm9, %v283_v18, -inf  ;;  %v297_v21 = vsel %vm292_vm9, %v285_v19, -inf }
 0x46c   :  { %v304_v22 = vmax.f32 %v271_v59, %v296_v20  ;;  %v305_v24 = vmax.f32 %v272_v60, %v297_v21 }
 0x46e   :  { %315 = vrot.lane.b32.xlu1 %v304_v22, %s690_s18  ;;  %v287_v25 = vpop.permute.xlu1 %286  ;;  %317 = vrot.lane.b32.xlu0 %v305_v24, %s690_s18  ;;  %v289_v29 = vpop.permute.xlu0 %288 }
 0x46f   :  { %v298_v30 = vsel %vm292_vm9, %v287_v25, -inf  ;;  %v299_v33 = vsel %vm292_vm9, %v289_v29, -inf }
 0x470   :  { %v306_v34 = vmax.f32 %v273_v2, %v298_v30  ;;  %v307_v37 = vmax.f32 %v274_v4, %v299_v33 }
 0x472   :  { %319 = vrot.lane.b32.xlu1 %v306_v34, %s690_s18  ;;  %v291_v38 = vpop.permute.xlu1 %290  ;;  %321 = vrot.lane.b32.xlu0 %v307_v37, %s690_s18 }
 0x473   :  { %v300_v39 = vsel %vm292_vm9, %v291_v38, -inf }
 0x474   :  { %v308_v41 = vmax.f32 %v275_v8, %v300_v39 }
 0x476   :  { %323 = vrot.lane.b32.xlu1 %v308_v41, %s690_s18 }
 0x4d4   :  { %v310_v43 = vpop.permute.xlu0 %309 }
 0x4d5   :  { %v326_v45 = vsel %vm325_vm10, %v310_v43, -inf }
 0x4d6   :  { %v334_v46 = vmax.f32 %v301_v11, %v326_v45 }
 0x4d8   :  { %342 = vrot.lane.b32.xlu0 %v334_v46, %s691_s19  ;;  %v314_v42 = vpop.permute.xlu0 %313 }
 0x4d9   :  { %v328_v47 = vsel %vm325_vm10, %v314_v42, -inf }
 0x4da   :  { %v336_v48 = vmax.f32 %v303_v14, %v328_v47 }
 0x4dc   :  { %v312_v49 = vpop.permute.xlu1 %311  ;;  %346 = vrot.lane.b32.xlu0 %v336_v48, %s691_s19 }
 0x4dd   :  { %v327_v50 = vsel %vm325_vm10, %v312_v49, -inf }
 0x4de   :  { %v335_v51 = vmax.f32 %v302_v17, %v327_v50 }
 0x4e0   :  { %344 = vrot.lane.b32.xlu1 %v335_v51, %s691_s19  ;;  %v316_v52 = vpop.permute.xlu1 %315  ;;  %v318_v26 = vpop.permute.xlu0 %317 }
 0x4e1   :  { %v329_v53 = vsel %vm325_vm10, %v316_v52, -inf  ;;  %v330_v54 = vsel %vm325_vm10, %v318_v26, -inf }
 0x4e2   :  { %v337_v55 = vmax.f32 %v304_v22, %v329_v53  ;;  %v338_v56 = vmax.f32 %v305_v24, %v330_v54 }
 0x4e4   :  { %348 = vrot.lane.b32.xlu1 %v337_v55, %s691_s19  ;;  %v320_v57 = vpop.permute.xlu1 %319  ;;  %350 = vrot.lane.b32.xlu0 %v338_v56, %s691_s19  ;;  %v322_v58 = vpop.permute.xlu0 %321 }
 0x4e5   :  { %v331_v59 = vsel %vm325_vm10, %v320_v57, -inf  ;;  %v332_v60 = vsel %vm325_vm10, %v322_v58, -inf }
 0x4e6   :  { %v339_v61 = vmax.f32 %v306_v34, %v331_v59  ;;  %v340_v62 = vmax.f32 %v307_v37, %v332_v60 }
 0x4e8   :  { %352 = vrot.lane.b32.xlu1 %v339_v61, %s691_s19  ;;  %v324_v63 = vpop.permute.xlu1 %323  ;;  %354 = vrot.lane.b32.xlu0 %v340_v62, %s691_s19 }
 0x4e9   :  { %v333_v0 = vsel %vm325_vm10, %v324_v63, -inf }
 0x4ea   :  { %v341_v2 = vmax.f32 %v308_v41, %v333_v0 }
 0x4ec   :  { %356 = vrot.lane.b32.xlu1 %v341_v2, %s691_s19 }
 0x54a   :  { %v343_v4 = vpop.permute.xlu0 %342 }
 0x54b   :  { %v359_v6 = vsel %vm358_vm11, %v343_v4, -inf }
 0x54c   :  { %v367_v7 = vmax.f32 %v334_v46, %v359_v6 }
 0x54e   :  { %375 = vrot.lane.b32.xlu0 %v367_v7, %s692_s20  ;;  %v347_v8 = vpop.permute.xlu0 %346 }
 0x54f   :  { %v361_v9 = vsel %vm358_vm11, %v347_v8, -inf }
 0x550   :  { %v369_v10 = vmax.f32 %v336_v48, %v361_v9 }
 0x552   :  { %v345_v11 = vpop.permute.xlu1 %344  ;;  %379 = vrot.lane.b32.xlu0 %v369_v10, %s692_s20 }
 0x553   :  { %v360_v13 = vsel %vm358_vm11, %v345_v11, -inf }
 0x554   :  { %v368_v12 = vmax.f32 %v335_v51, %v360_v13 }
 0x556   :  { %377 = vrot.lane.b32.xlu1 %v368_v12, %s692_s20  ;;  %v349_v14 = vpop.permute.xlu1 %348  ;;  %v351_v15 = vpop.permute.xlu0 %350 }
 0x557   :  { %v362_v16 = vsel %vm358_vm11, %v349_v14, -inf  ;;  %v363_v17 = vsel %vm358_vm11, %v351_v15, -inf }
 0x558   :  { %v370_v18 = vmax.f32 %v337_v55, %v362_v16  ;;  %v371_v19 = vmax.f32 %v338_v56, %v363_v17 }
 0x55a   :  { %381 = vrot.lane.b32.xlu1 %v370_v18, %s692_s20  ;;  %v353_v20 = vpop.permute.xlu1 %352  ;;  %383 = vrot.lane.b32.xlu0 %v371_v19, %s692_s20  ;;  %v355_v21 = vpop.permute.xlu0 %354 }
 0x55b   :  { %v364_v22 = vsel %vm358_vm11, %v353_v20, -inf  ;;  %v365_v24 = vsel %vm358_vm11, %v355_v21, -inf }
 0x55c   :  { %v372_v25 = vmax.f32 %v339_v61, %v364_v22  ;;  %v373_v29 = vmax.f32 %v340_v62, %v365_v24 }
 0x55e   :  { %385 = vrot.lane.b32.xlu1 %v372_v25, %s692_s20  ;;  %v357_v30 = vpop.permute.xlu1 %356  ;;  %387 = vrot.lane.b32.xlu0 %v373_v29, %s692_s20 }
 0x55f   :  { %v366_v33 = vsel %vm358_vm11, %v357_v30, -inf }
 0x560   :  { %v374_v34 = vmax.f32 %v341_v2, %v366_v33 }
 0x562   :  { %389 = vrot.lane.b32.xlu1 %v374_v34, %s692_s20 }
 0x5c0   :  { %v376_v37 = vpop.permute.xlu0 %375 }
 0x5c1   :  { %v392_v38 = vsel %vm391_vm12, %v376_v37, -inf }
 0x5c2   :  { %v400_v39 = vmax.f32 %v367_v7, %v392_v38 }
 0x5c4   :  { %408 = vrot.lane.b32.xlu0 %v400_v39, %s693_s21  ;;  %v380_v41 = vpop.permute.xlu0 %379 }
 0x5c5   :  { %v394_v43 = vsel %vm391_vm12, %v380_v41, -inf }
 0x5c6   :  { %v402_v45 = vmax.f32 %v369_v10, %v394_v43 }
 0x5c8   :  { %v378_v46 = vpop.permute.xlu1 %377  ;;  %412 = vrot.lane.b32.xlu0 %v402_v45, %s693_s21 }
 0x5c9   :  { %v393_v42 = vsel %vm391_vm12, %v378_v46, -inf }
 0x5ca   :  { %v401_v47 = vmax.f32 %v368_v12, %v393_v42 }
 0x5cc   :  { %410 = vrot.lane.b32.xlu1 %v401_v47, %s693_s21  ;;  %v382_v48 = vpop.permute.xlu1 %381  ;;  %v384_v49 = vpop.permute.xlu0 %383 }
 0x5cd   :  { %v395_v50 = vsel %vm391_vm12, %v382_v48, -inf  ;;  %v396_v51 = vsel %vm391_vm12, %v384_v49, -inf }
 0x5ce   :  { %v403_v52 = vmax.f32 %v370_v18, %v395_v50  ;;  %v404_v26 = vmax.f32 %v371_v19, %v396_v51 }
 0x5d0   :  { %414 = vrot.lane.b32.xlu1 %v403_v52, %s693_s21  ;;  %v386_v53 = vpop.permute.xlu1 %385  ;;  %416 = vrot.lane.b32.xlu0 %v404_v26, %s693_s21  ;;  %v388_v54 = vpop.permute.xlu0 %387 }
 0x5d1   :  { %v397_v55 = vsel %vm391_vm12, %v386_v53, -inf  ;;  %v398_v56 = vsel %vm391_vm12, %v388_v54, -inf }
 0x5d2   :  { %v405_v57 = vmax.f32 %v372_v25, %v397_v55  ;;  %v406_v58 = vmax.f32 %v373_v29, %v398_v56 }
 0x5d4   :  { %418 = vrot.lane.b32.xlu1 %v405_v57, %s693_s21  ;;  %v390_v59 = vpop.permute.xlu1 %389  ;;  %420 = vrot.lane.b32.xlu0 %v406_v58, %s693_s21 }
 0x5d5   :  { %v399_v60 = vsel %vm391_vm12, %v390_v59, -inf }
 0x5d6   :  { %v407_v61 = vmax.f32 %v374_v34, %v399_v60 }
 0x5d8   :  { %422 = vrot.lane.b32.xlu1 %v407_v61, %s693_s21 }
 0x636   :  { %v409_v62 = vpop.permute.xlu0 %408 }
 0x637   :  { %v425_v8 = vsel %vm424_vm13, %v409_v62, -inf }
 0x638   :  { %v433_v19 = vmax.f32 %v400_v39, %v425_v8 }
 0x63a   :  { %v413_v63 = vpop.permute.xlu0 %412  ;;  %v441_v38 = vsel %vm29_vm0, %v433_v19, inf }
 0x63b   :  { %v427_v11 = vsel %vm424_vm13, %v413_v63, -inf }
 0x63c   :  { %v435_v20 = vmax.f32 %v402_v45, %v427_v11 }
 0x63e   :  { %v411_v0 = vpop.permute.xlu1 %410  ;;  %v443_v39 = vsel %vm31_vm1, %v435_v20, inf }
 0x63f   :  { %v426_v6 = vsel %vm424_vm13, %v411_v0, -inf }
 0x640   :  { %v434_v15 = vmax.f32 %v401_v47, %v426_v6 }
 0x642   :  { %v415_v2 = vpop.permute.xlu1 %414  ;;  %v417_v4 = vpop.permute.xlu0 %416  ;;  %v442_v29 = vsel %vm30_vm2, %v434_v15, inf  ;;  %v616_v15 = vld [vmem:[%s1058_s1] ss:$0 sm:$0xff] }
 0x643   :  { %v429_v7 = vsel %vm424_vm13, %v417_v4, -inf  ;;  %v428_v13 = vsel %vm424_vm13, %v415_v2, -inf  ;;  %vm522_vm0 = vcmp.eq.s32.totalorder %v750_v32, %v616_v15  ;;  %vm520_vm1 = vcmp.eq.s32.totalorder %v730_v23, %v616_v15 }
 0x644   :  { %v437_v16 = vmax.f32 %v404_v26, %v429_v7  ;;  %v436_v21 = vmax.f32 %v403_v52, %v428_v13  ;;  %vm524_vm2 = vcmp.eq.s32.totalorder %v747_v31, %v616_v15 }
 0x646   :  { %v419_v9 = vpop.permute.xlu1 %418  ;;  %v421_v10 = vpop.permute.xlu0 %420  ;;  %v445_v30 = vsel %vm33_vm3, %v437_v16, inf  ;;  %v444_v41 = vsel %vm32_vm4, %v436_v21, inf  ;;  %vm521_vm3 = vcmp.eq.s32.totalorder %v735_v27, %v616_v15  ;;  %vm526_vm4 = vcmp.eq.s32.totalorder %v757_v35, %v616_v15 }
 0x647   :  { %v430_v12 = vsel %vm424_vm13, %v419_v9, -inf  ;;  %v431_v14 = vsel %vm424_vm13, %v421_v10, -inf  ;;  %v449_v45 = vmin.f32 %v441_v38, %v445_v30 }
 0x648   :  { %v438_v17 = vmax.f32 %v405_v57, %v430_v12  ;;  %v439_v18 = vmax.f32 %v406_v58, %v431_v14 }
 0x64a   :  { %v446_v22 = vsel %vm34_vm6, %v438_v17, inf  ;;  %v423_v24 = vpop.permute.xlu1 %422  ;;  %v447_v33 = vsel %vm35_vm5, %v439_v18, inf  ;;  %vm523_vm5 = vcmp.eq.s32.totalorder %v760_v36, %v616_v15  ;;  %vm525_vm6 = vcmp.eq.s32.totalorder %v768_v40, %v616_v15 }
 0x64b   :  { %v432_v25 = vsel %vm424_vm13, %v423_v24, -inf  ;;  %v450_v37 = vmin.f32 %v442_v29, %v446_v22  ;;  %v451_v46 = vmin.f32 %v443_v39, %v447_v33 }
 0x64c   :  { %v440_v34 = vmax.f32 %v407_v61, %v432_v25 }
 0x64d   :  { %v453_v47 = vmin.f32 %v449_v45, %v450_v37 }
 0x64e   :  { %v448_v43 = vsel %vm36_vm7, %v440_v34, inf  ;;  %vm527_vm7 = vcmp.eq.s32.totalorder %v775_v44, %v616_v15 }
 0x64f   :  { %v452_v42 = vmin.f32 %v444_v41, %v448_v43 }
 0x651   :  { %v454_v48 = vmin.f32 %v451_v46, %v452_v42 }
 0x653   :  { %v455_v49 = vmin.f32 %v453_v47, %v454_v48 }
 0x655   :  { %v456_v50 = vrot.slane %v455_v49, 4 }
 0x657   :  { %v457_v51 = vmin.f32 %v455_v49, %v456_v50 }
 0x659   :  { %v458_v52 = vrot.slane %v457_v51, 2 }
 0x65b   :  { %v459_v26 = vmin.f32 %v457_v51, %v458_v52 }
 0x65d   :  { %v460_v53 = vrot.slane %v459_v26, 1 }
 0x65f   :  { %v461_v54 = vmin.f32 %v459_v26, %v460_v53 }
 0x661   :  { %v462_v55 = vsub.f32 %v721_v5, %v461_v54 }
 0x663   :  { %v464_v56 = vsel %vm463_vm15, %v462_v55, 0.0  ;;  %v475_v3 = vsel %vm19_vm14, %v462_v55, 0.0 }
 0x664   :  { %465 = vadd.xlane.f32.xlu0 %v464_v56  ;;  %v476_v57 = vsel %vm463_vm15, %v475_v3, 0.0 }
 0x665   :  { %477 = vadd.xlane.f32.xlu1 %v476_v57 }
 0x6f1   :  { %v466_v58 = vpop.xlane.xlu0 %465 }
 0x6f2   :  { %v467_v59 = vrot.slane %v466_v58, 4  ;;  %v478_v60 = vpop.xlane.xlu1 %477 }
 0x6f3   :  { %v479_v61 = vrot.slane %v478_v60, 4 }
 0x6f4   :  { %v468_v62 = vadd.f32 %v467_v59, %v466_v58 }
 0x6f5   :  { %v480_v63 = vadd.f32 %v479_v61, %v478_v60 }
 0x6f6   :  { %v469_v0 = vrot.slane %v468_v62, 2 }
 0x6f7   :  { %v481_v2 = vrot.slane %v480_v63, 2 }
 0x6f8   :  { %v470_v4 = vadd.f32 %v469_v0, %v468_v62 }
 0x6f9   :  { %v482_v6 = vadd.f32 %v481_v2, %v480_v63 }
 0x6fa   :  { %v471_v5 = vrot.slane %v470_v4, 1 }
 0x6fb   :  { %v483_v7 = vrot.slane %v482_v6, 1 }
 0x6fc   :  { %v472_v8 = vadd.f32 %v471_v5, %v470_v4 }
 0x6fd   :  { %v484_v9 = vadd.f32 %v483_v7, %v482_v6 }
 0x6fe   :  { %617 = vpush %v472_v8 }
 0x6ff   :  { %619 = vpush %v484_v9 }
 0x72f   :  { %s618_s22 = spop %617 }
 0x730   :  { %v474_v10 = vstv %s618_s22  ;;  %s620_s23 = spop %619 }
 0x731   :  { %v486_v11 = vstv %s620_s23 }
 0x732   :  { %v487_v13 = vsub.f32 %v474_v10, %v486_v11 }
 0x734   :  { %v488_v12 = vsel %vm19_vm14, %v486_v11, %v487_v13 }
 0x735   :  { %v489_v14 = vmul.f32 0.015625, %v488_v12 }
 0x737   :  { %v490_v16 = vsub.f32 %v462_v55, %v489_v14 }
 0x739   :  { %v532_v17 = vrot.slane %v490_v16, %v738_v28  ;;  %v491_v22 = vmul.f32 %v490_v16, %v490_v16 }
 0x73b   :  { %v536_v18 = vsel %vm522_vm0, %v532_v17, 0.0  ;;  %v534_v19 = vsel %vm520_vm1, %v532_v17, 0.0  ;;  %v538_v20 = vsel %vm524_vm2, %v532_v17, 0.0  ;;  %v535_v21 = vsel %vm521_vm3, %v532_v17, 0.0 }
 0x73c   :  { %546 = vadd.xlane.f32.xlu1 %v536_v18  ;;  %542 = vadd.xlane.f32.xlu0 %v534_v19  ;;  %v540_v32 = vsel %vm526_vm4, %v532_v17, 0.0  ;;  %v537_v23 = vsel %vm523_vm5, %v532_v17, 0.0  ;;  %v539_v28 = vsel %vm525_vm6, %v532_v17, 0.0  ;;  %v492_v31 = vsel %vm463_vm15, %v491_v22, 0.0 }
 0x73d   :  { %v541_v27 = vsel %vm527_vm7, %v532_v17, 0.0  ;;  %v503_v35 = vsel %vm19_vm14, %v491_v22, 0.0  ;;  %vm599_vm14 = vcmask 0  }
 0x73e   :  { %v504_v36 = vsel %vm463_vm15, %v503_v35, 0.0 }
 0x740   :  { %550 = vadd.xlane.f32.xlu1 %v538_v20  ;;  %544 = vadd.xlane.f32.xlu0 %v535_v21 }
 0x744   :  { %554 = vadd.xlane.f32.xlu1 %v540_v32  ;;  %548 = vadd.xlane.f32.xlu0 %v537_v23 }
 0x748   :  { %552 = vadd.xlane.f32.xlu0 %v539_v28  ;;  %493 = vadd.xlane.f32.xlu1 %v492_v31 }
 0x74c   :  { %556 = vadd.xlane.f32.xlu0 %v541_v27 }
 0x750   :  { %505 = vadd.xlane.f32.xlu0 %v504_v36 }
 0x7c9   :  { %v547_v24 = vpop.xlane.xlu1 %546  ;;  %v543_v25 = vpop.xlane.xlu0 %542 }
 0x7ca   :  { %v558_v29 = vmul.f32 %v543_v25, %v543_v25  ;;  %v560_v33 = vmul.f32 %v547_v24, %v547_v24 }
 0x7cc   :  { %v567_v37 = vsel %vm566_vm8, %v558_v29, 0.0  ;;  %v570_v1 = vsel %vm566_vm8, %v560_v33, 0.0 }
 0x7cd   :  { %v551_v40 = vpop.xlane.xlu1 %550  ;;  %v545_v30 = vpop.xlane.xlu0 %544 }
 0x7ce   :  { %v559_v34 = vmul.f32 %v545_v30, %v545_v30  ;;  %v562_v43 = vmul.f32 %v551_v40, %v551_v40 }
 0x7d0   :  { %v568_v44 = vsel %vm566_vm8, %v559_v34, 0.0  ;;  %v574_v50 = vsel %vm566_vm8, %v562_v43, 0.0 }
 0x7d1   :  { %v569_v38 = vadd.f32 %v568_v44, %v567_v37  ;;  %v555_v39 = vpop.xlane.xlu1 %554  ;;  %v549_v41 = vpop.xlane.xlu0 %548 }
 0x7d2   :  { %v561_v45 = vmul.f32 %v549_v41, %v549_v41  ;;  %v564_v51 = vmul.f32 %v555_v39, %v555_v39 }
 0x7d3   :  { %v571_v46 = vadd.f32 %v570_v1, %v569_v38 }
 0x7d4   :  { %v572_v42 = vsel %vm566_vm8, %v561_v45, 0.0  ;;  %v578_v57 = vsel %vm566_vm8, %v564_v51, 0.0 }
 0x7d5   :  { %v573_v47 = vadd.f32 %v572_v42, %v571_v46  ;;  %v553_v48 = vpop.xlane.xlu0 %552  ;;  %v494_v49 = vpop.xlane.xlu1 %493 }
 0x7d6   :  { %v563_v52 = vmul.f32 %v553_v48, %v553_v48  ;;  %v495_v26 = vrot.slane %v494_v49, 4 }
 0x7d7   :  { %v575_v53 = vadd.f32 %v574_v50, %v573_v47 }
 0x7d8   :  { %v576_v54 = vsel %vm566_vm8, %v563_v52, 0.0  ;;  %v496_v55 = vadd.f32 %v495_v26, %v494_v49 }
 0x7d9   :  { %v577_v56 = vadd.f32 %v576_v54, %v575_v53  ;;  %v557_v3 = vpop.xlane.xlu0 %556 }
 0x7da   :  { %v497_v58 = vrot.slane %v496_v55, 2  ;;  %v565_v59 = vmul.f32 %v557_v3, %v557_v3 }
 0x7db   :  { %v579_v60 = vadd.f32 %v578_v57, %v577_v56 }
 0x7dc   :  { %v580_v61 = vsel %vm566_vm8, %v565_v59, 0.0  ;;  %v498_v62 = vadd.f32 %v497_v58, %v496_v55 }
 0x7dd   :  { %v506_v63 = vpop.xlane.xlu0 %505  ;;  %v581_v0 = vadd.f32 %v580_v61, %v579_v60 }
 0x7de   :  { %v507_v2 = vrot.slane %v506_v63, 4  ;;  %v499_v4 = vrot.slane %v498_v62, 1 }
 0x7df   :  { %582 = vadd.xlane.f32.xlu1 %v581_v0 }
 0x7e0   :  { %v508_v6 = vadd.f32 %v507_v2, %v506_v63  ;;  %v500_v5 = vadd.f32 %v499_v4, %v498_v62 }
 0x7e2   :  { %v509_v7 = vrot.slane %v508_v6, 2  ;;  %621 = vpush %v500_v5 }
 0x7e4   :  { %v510_v8 = vadd.f32 %v509_v7, %v508_v6 }
 0x7e6   :  { %v511_v9 = vrot.slane %v510_v8, 1 }
 0x7e8   :  { %v512_v10 = vadd.f32 %v511_v9, %v510_v8 }
 0x7ea   :  { %623 = vpush %v512_v10 }
 0x813   :  { %s622_s1 = spop %621 }
 0x814   :  { %v502_v19 = vstv %s622_s1 }
 0x81b   :  { %s624_s26 = spop %623 }
 0x81c   :  { %v514_v18 = vstv %s624_s26 }
 0x81d   :  { %v515_v20 = vsub.f32 %v502_v19, %v514_v18 }
 0x81f   :  { %v595_v21 = vmul.f32 %v515_v20, %v514_v18 }
 0x821   :  { %656 = vrsqrt.f32 %v595_v21 }
 0x82b   :  { %v657_v31 = vpop.eup %656 }
 0x86c   :  { %v583_v11 = vpop.xlane.xlu1 %582 }
 0x86d   :  { %v584_v13 = vrot.slane %v583_v11, 4 }
 0x86f   :  { %v585_v12 = vadd.f32 %v584_v13, %v583_v11 }
 0x871   :  { %v586_v14 = vrot.slane %v585_v12, 2 }
 0x873   :  { %v587_v15 = vadd.f32 %v586_v14, %v585_v12 }
 0x875   :  { %v588_v16 = vrot.slane %v587_v15, 1 }
 0x877   :  { %v589_v17 = vadd.f32 %v588_v16, %v587_v15 }
 0x879   :  { %625 = vpush %v589_v17 }
 0x8aa   :  { %s626_s27 = spop %625 }
 0x8ab   :  { %v591_v32 = vstv %s626_s27 }
 0x8ac   :  { %v592_v23 = vsub.f32 %v591_v32, %v514_v18 }
 0x8ae   :  { %v593_v22 = vsub.f32 %v592_v23, %v515_v20 }
 0x8b0   :  { %v594_v28 = vmul.f32 0.5, %v593_v22 }
 0x8b2   :  { %v597_v27 = vmul.f32 %v657_v31, %v594_v28 }
 0x8b4   :  { %v598_v35 = vsub.f32 0.0, %v597_v27 }
 0x8b6   :  { %600 = vst.msk [vmem:[#allocation2] sm:$0x1] %vm599_vm14, %v598_v35 }
 0x8b7   :  { %669 = shalt.err (!%p666_p4)
}
 0x8b8   :  { %s670_s6 = scalar_lea.hbm %s1059_s2, 16 }
 0x8b9   :  { %p671_p5 = scmp.ne.s32.totalorder %s1059_s2, %s670_s6  ;;  %p674_p6 = scmp.lt.u32.totalorder %s670_s6, %s1059_s2 }
 0x8bb   :  { %p676_p7 = pnand %p674_p6, %p671_p5 }
 0x8bd   :  { %679 = shalt.err (!%p676_p7)
}
 0x8be   :  { %610 = dma.vmem_to_hbm [thread:$0]  %s608_s29, 16, %s1059_s2, [#allocation3]  }
 0x8bf   :  { %680 = dma.done.wait [#allocation3], 16  }
 0x8c0   :  { %681 = vsyncadd [#allocation3], 4294967280 }
 0x8c1   :  { %614 = vsyncpa [#allocation3], 1 }

</bundles_post_ra>
